<compile_context>
chip_gen: v7x
topology: tpu7x:2x2x1
jax: 0.10.0
libtpu: 0.0.40
codegen_flags: <defaults>
</compile_context>

<pallas_src>
import jax
import jax.numpy as jnp
from jax.experimental import pallas as pl
from jax.experimental.pallas import tpu as pltpu


# ----------------------------- small helpers --------------------------------

def _round_up(n, m):
    return ((n + m - 1) // m) * m


def _cdiv(a, b):
    return (a + b - 1) // b


def _feat_pad(dim):
    # 256-wide MXUs on v6e/v7x like multiples of 256 once dims are large;
    # 128 keeps padding FLOPs small for small dims (and is optimal on v5e).
    return _round_up(dim, 256 if dim >= 256 else 128)


def _pick_tile(dim, candidates=(512, 256, 128)):
    for c in candidates:
        if dim % c == 0:
            return c
    return dim


def _vmem_capacity_bytes():
    """Physical VMEM per core; conservative 64 MiB (v7x) if the query fails."""
    try:
        info = pltpu.get_tpu_info()
        for name in ("vmem_capacity_bytes", "vmem_size_bytes", "vmem_bytes"):
            v = getattr(info, name, None)
            if v:
                return int(v)
    except Exception:
        pass
    return 64 << 20


def _pick_batch_tile(batch, batch_tile):
    """Tile rows: multiple of 16 (bf16 sublanes), minimal over-padding, and
    >=2 tiles when the batch permits so both v7x TensorCores get work."""
    n_tiles = max(1, _cdiv(batch, max(16, int(batch_tile))))
    if n_tiles == 1 and batch >= 32:
        n_tiles = 2
    return _round_up(_cdiv(batch, n_tiles), 16)


# ----------------------------- parameter prep -------------------------------

def prepare_params(weights, biases):
    """Pad feature dims to lane multiples ONCE (hoisted out of the per-call path).
    Weights -> bf16 (MXU inputs), biases stay fp32 (added to the fp32 accumulator).
    Returns (w_padded, b_padded, dims) with dims[i] = (fi, fo, fi_pad, fo_pad)."""
    w_padded, b_padded, dims = [], [], []
    for w, b in zip(weights, biases):
        fi, fo = w.shape
        fi_p, fo_p = _feat_pad(fi), _feat_pad(fo)
        w_p = jnp.zeros((fi_p, fo_p), jnp.float32).at[:fi, :fo].set(w)
        b_p = jnp.zeros((1, fo_p), jnp.float32).at[:, :fo].set(
            jnp.asarray(b, jnp.float32).reshape(1, -1))
        w_padded.append(w_p.astype(jnp.bfloat16))
        b_padded.append(b_p)
        dims.append((fi, fo, fi_p, fo_p))
    return w_padded, b_padded, dims


# ------------------------------- kernels ------------------------------------

def _make_fused_kernel(num_layers):
    """Whole MLP on one batch tile. Ref order: (x, w0, b0, ..., w_{L-1}, b_{L-1}, o)."""
    def kernel(*refs):
        x_ref = refs[0]
        o_ref = refs[-1]
        params = refs[1:-1]
        h = x_ref[...]                                   # bf16 batch tile
        for layer in range(num_layers):
            w = params[2 * layer][...]                   # bf16 [in_pad, out_pad]
            b = params[2 * layer + 1][...]               # f32  [1, out_pad]
            acc = jnp.dot(h, w, preferred_element_type=jnp.float32) + b
            if layer < num_layers - 1:
                # relu(bf16(x)) == bf16(relu(x)); doing it on bf16 halves VPU bytes
                # on v6e/v7x and feeds the next matmul directly.
                h = jnp.maximum(acc.astype(jnp.bfloat16), 0)
            else:
                h = acc                                  # fp32 final activation
        # TODO(synk): nn.Dropout(0.3) is identity in eval mode; training-mode
        # stochastic masking (pltpu.prng_*) intentionally not emulated here.
        o_ref[...] = h.astype(o_ref.dtype)
    return kernel


def _make_linear_kernel(apply_relu):
    """One Linear (+ optional ReLU), tiled over (M, N, K) with fp32 accumulator."""
    def kernel(x_ref, w_ref, b_ref, o_ref, acc_ref):
        @pl.when(pl.program_id(2) == 0)
        def _():
            acc_ref[...] = jnp.zeros_like(acc_ref)
        acc_ref[...] += jnp.dot(x_ref[...], w_ref[...],
                                preferred_element_type=jnp.float32)

        @pl.when(pl.program_id(2) == pl.num_programs(2) - 1)
        def _():
            h = acc_ref[...] + b_ref[...]
            if apply_relu:
                h = jnp.maximum(h, 0.0)
            o_ref[...] = h.astype(o_ref.dtype)
    return kernel


# ----------------------------- pallas wrappers -------------------------------

def _fused_mlp_call(x_p, flat_params, *, tb, in_pad, out_pad, num_layers,
                    vmem_budget, cost, single_buffer_weights):
    grid = (x_p.shape[0] // tb,)
    wkwargs = ({"pipeline_mode": pl.Buffered(1)} if single_buffer_weights else {})
    in_specs = [pl.BlockSpec((tb, in_pad), lambda i: (i, 0))]
    for p in flat_params:
        # Weights/biases pinned: same block every grid step -> VMEM-resident,
        # single-buffered (never re-fetched).
        in_specs.append(pl.BlockSpec(p.shape, lambda i: (0, 0), **wkwargs))
    out_spec = pl.BlockSpec((tb, out_pad), lambda i: (i, 0))

    return pl.pallas_call(
        _make_fused_kernel(num_layers),
        out_shape=jax.ShapeDtypeStruct((x_p.shape[0], out_pad), jnp.float32),
        grid=grid,
        in_specs=in_specs,
        out_specs=out_spec,
        compiler_params=pltpu.CompilerParams(
            dimension_semantics=("parallel",),       # megacore sharding on v7x
            vmem_limit_bytes=int(vmem_budget)),
        cost_estimate=cost,
    )(x_p, *flat_params)


def _linear_layer(x_p, w_p, b_p, *, apply_relu, out_dtype, tm, vmem_budget):
    """Fallback: one tiled Linear layer (used when params don't fit VMEM)."""
    M, K = x_p.shape
    N = w_p.shape[1]
    tn = _pick_tile(N)
    tk = _pick_tile(K)
    grid = (M // tm, N // tn, K // tk)
    flops = 2 * M * K * N
    bytes_accessed = (M * K * 2 + K * N * 2 + N * 4
                      + M * N * jnp.dtype(out_dtype).itemsize)
    return pl.pallas_call(
        _make_linear_kernel(apply_relu),
        out_shape=jax.ShapeDtypeStruct((M, N), out_dtype),
        grid=grid,
        in_specs=[pl.BlockSpec((tm, tk), lambda i, j, k: (i, k)),
                  pl.BlockSpec((tk, tn), lambda i, j, k: (k, j)),
                  pl.BlockSpec((1, tn), lambda i, j, k: (0, j))],
        out_specs=pl.BlockSpec((tm, tn), lambda i, j, k: (i, j)),
        scratch_shapes=[pltpu.VMEM((tm, tn), jnp.float32)],
        compiler_params=pltpu.CompilerParams(
            dimension_semantics=("parallel", "parallel", "arbitrary"),
            vmem_limit_bytes=int(vmem_budget)),
        cost_estimate=pl.CostEstimate(flops=int(flops), transcendentals=0,
                                      bytes_accessed=int(bytes_accessed)),
    )(x_p, w_p, b_p)


def mlp_forward(x, weights, biases, *, batch_tile=512, padded_params=None,
                force_layerwise=False):
    """x: [batch, in_dim] fp32. weights[i]: [in_i, out_i] fp32, biases[i]: [out_i] or
    [1, out_i] fp32. Returns fp32 [batch, out_dim] (PyTorch-eval-mode semantics)."""
    if padded_params is None:
        padded_params = prepare_params(weights, biases)
    w_padded, b_padded, dims = padded_params

    num_layers = len(w_padded)
    batch, in_dim = x.shape
    out_dim = dims[-1][1]
    in_pad = dims[0][2]
    out_pad = dims[-1][3]
    max_feat = max(max(d[2], d[3]) for d in dims)

    flat_params = []
    for w_p, b_p in zip(w_padded, b_padded):
        flat_params.append(w_p)
        flat_params.append(b_p)
    param_bytes = sum(int(p.size) * p.dtype.itemsize for p in flat_params)

    vmem_cap = _vmem_capacity_bytes()
    budget_cap = int(vmem_cap * 0.75)

    def fused_need(t):
        # params counted 2x (worst case: double-buffered), double-buffered bf16 x /
        # fp32 out tiles, plus intermediate activations.
        tile_io = 2 * (t * in_pad * 2 + t * out_pad * 4)
        act = 2 * t * max_feat * 4
        return 2 * param_bytes + tile_io + act

    # Batch tile: multiple of 16, minimal over-padding, >=2 tiles when possible.
    tb = _pick_batch_tile(batch, batch_tile)
    while fused_need(tb) > budget_cap and tb > 16:
        tb = max(16, _round_up(tb // 2, 16))
    batch_p = _round_up(batch, tb)

    # Stream x in bf16 (halves input DMA bytes; fp32 accumulation in-kernel).
    x_p = jnp.zeros((batch_p, in_pad), jnp.bfloat16).at[:batch, :in_dim].set(
        x.astype(jnp.bfloat16))

    use_fused = (not force_layerwise) and fused_need(tb) <= budget_cap

    if use_fused:
        vmem_budget = min(max(fused_need(tb) + (4 << 20), 16 << 20), budget_cap)
        flops = 2 * batch_p * sum(d[2] * d[3] for d in dims)
        cost = pl.CostEstimate(
            flops=int(flops), transcendentals=0,
            bytes_accessed=int(batch_p * in_pad * 2 + batch_p * out_pad * 4
                               + param_bytes))
        try:
            out = _fused_mlp_call(x_p, flat_params, tb=tb, in_pad=in_pad,
                                  out_pad=out_pad, num_layers=num_layers,
                                  vmem_budget=vmem_budget, cost=cost,
                                  single_buffer_weights=True)
        except Exception:
            # jax version without BlockSpec(pipeline_mode=...) support -> default
            # double-buffering (budget above already accounts for it).
            out = _fused_mlp_call(x_p, flat_params, tb=tb, in_pad=in_pad,
                                  out_pad=out_pad, num_layers=num_layers,
                                  vmem_budget=vmem_budget, cost=cost,
                                  single_buffer_weights=False)
    else:
        # Params too large to keep VMEM-resident: per-layer tiled matmul kernels.
        lw_budget = min(48 << 20, budget_cap)
        h = x_p
        for layer, (w_p, b_p) in enumerate(zip(w_padded, b_padded)):
            last = layer == num_layers - 1
            h = _linear_layer(h, w_p, b_p, apply_relu=not last,
                              out_dtype=jnp.float32 if last else jnp.bfloat16,
                              tm=tb, vmem_budget=lw_budget)
        out = h

    return out[:batch, :out_dim]


# ------------------------------ init + demo ----------------------------------

def init_params(key, input_size, hidden_sizes, output_size):
    """Deterministic init mimicking nn.Linear default (uniform +/- 1/sqrt(fan_in))."""
    sizes = [input_size] + list(hidden_sizes) + [output_size]
    weights, biases = [], []
    for i in range(len(sizes) - 1):
        fan_in, fan_out = sizes[i], sizes[i + 1]
        key, kw, kb = jax.random.split(key, 3)
        bound = 1.0 / jnp.sqrt(jnp.float32(fan_in))
        weights.append(jax.random.uniform(kw, (fan_in, fan_out), jnp.float32,
                                          -bound, bound))
        biases.append(jax.random.uniform(kb, (1, fan_out), jnp.float32,
                                         -bound, bound))
    return weights, biases


if __name__ == "__main__":
    # Small shapes consistent with MLPModel(input_size, hidden_sizes, output_size).
    batch = 8
    input_size = 32
    hidden_sizes = [64, 32]
    output_size = 16

    key = jax.random.PRNGKey(0)
    key, kx = jax.random.split(key)
    x = jax.random.normal(kx, (batch, input_size), jnp.float32)
    weights, biases = init_params(key, input_size, hidden_sizes, output_size)

    # Pad / cast parameters ONCE (hoisted out of the per-call path).
    padded = prepare_params(weights, biases)

    out = mlp_forward(x, weights, biases, padded_params=padded)
    out = jax.block_until_ready(out)
    assert out.shape == (batch, output_size)

    # Reference with the SAME numerics as the kernel (bf16 matmul inputs, fp32 acc).
    ref = x.astype(jnp.bfloat16)
    for i, (w, b) in enumerate(zip(weights, biases)):
        ref = jnp.dot(ref, w.astype(jnp.bfloat16),
                      preferred_element_type=jnp.float32) + b
        if i < len(weights) - 1:
            ref = jnp.maximum(ref, 0.0).astype(jnp.bfloat16)
    assert jnp.allclose(out, ref.astype(jnp.float32), atol=1e-2, rtol=1e-2)

    # Loose sanity check against the pure-fp32 PyTorch-equivalent path.
    ref32 = x
    for i, (w, b) in enumerate(zip(weights, biases)):
        ref32 = ref32 @ w + b
        if i < len(weights) - 1:
            ref32 = jnp.maximum(ref32, 0.0)
    assert jnp.allclose(out, ref32, atol=1e-1, rtol=1e-1)

    # Also exercise the layer-wise fallback path (used when params exceed VMEM).
    out_lw = jax.block_until_ready(
        mlp_forward(x, weights, biases, padded_params=padded,
                    force_layerwise=True))
    assert jnp.allclose(out_lw, out, atol=1e-3, rtol=1e-3)

    print("KERNEL_OK")
</pallas_src>

<mosaic_0001>
module attributes {stable_mosaic.version = 11 : i64} {
  func.func @kernel(%arg0: i32, %arg1: memref<16x128xbf16, #tpu.memory_space<vmem>>, %arg2: memref<128x128xbf16, #tpu.memory_space<vmem>>, %arg3: memref<1x128xf32, #tpu.memory_space<vmem>>, %arg4: memref<128x128xbf16, #tpu.memory_space<vmem>>, %arg5: memref<1x128xf32, #tpu.memory_space<vmem>>, %arg6: memref<128x128xbf16, #tpu.memory_space<vmem>>, %arg7: memref<1x128xf32, #tpu.memory_space<vmem>>, %arg8: memref<16x128xf32, #tpu.memory_space<vmem>>) attributes {dimension_semantics = [#tpu.dimension_semantics<parallel>], iteration_bounds = array<i64: 1>, scalar_prefetch = 0 : i64, scratch_operands = 0 : i64, tpu.core_type = #tpu.core_type<tc>, window_params = [{transform_indices = @transform_0, window_bounds = array<i64: 16, 128>}, {pipeline_mode = #tpu.pipeline_mode<synchronous>, transform_indices = @transform_1, window_bounds = array<i64: 128, 128>}, {pipeline_mode = #tpu.pipeline_mode<synchronous>, transform_indices = @transform_2, window_bounds = array<i64: 1, 128>}, {pipeline_mode = #tpu.pipeline_mode<synchronous>, transform_indices = @transform_3, window_bounds = array<i64: 128, 128>}, {pipeline_mode = #tpu.pipeline_mode<synchronous>, transform_indices = @transform_4, window_bounds = array<i64: 1, 128>}, {pipeline_mode = #tpu.pipeline_mode<synchronous>, transform_indices = @transform_5, window_bounds = array<i64: 128, 128>}, {pipeline_mode = #tpu.pipeline_mode<synchronous>, transform_indices = @transform_6, window_bounds = array<i64: 1, 128>}, {transform_indices = @transform_7, window_bounds = array<i64: 16, 128>}]} {
    %c0 = arith.constant 0 : index
    %c0_0 = arith.constant 0 : index
    %0 = vector.load %arg1[%c0, %c0_0] : memref<16x128xbf16, #tpu.memory_space<vmem>>, vector<16x128xbf16>
    %c0_1 = arith.constant 0 : index
    %c0_2 = arith.constant 0 : index
    %1 = vector.load %arg2[%c0_1, %c0_2] : memref<128x128xbf16, #tpu.memory_space<vmem>>, vector<128x128xbf16>
    %c0_3 = arith.constant 0 : index
    %c0_4 = arith.constant 0 : index
    %2 = vector.load %arg3[%c0_3, %c0_4] : memref<1x128xf32, #tpu.memory_space<vmem>>, vector<1x128xf32>
    %cst = arith.constant dense<0.000000e+00> : vector<16x128xf32>
    %3 = tpu.matmul %0, %1, %cst {dimension_numbers = #tpu.dot_dimension_numbers<[1], [0], [0], [1], [0, 0, 1, 1], [], []>} : vector<16x128xbf16>, vector<128x128xbf16>, vector<16x128xf32> -> vector<16x128xf32>
    %4 = vector.broadcast %2 : vector<1x128xf32> to vector<16x128xf32>
    %5 = arith.addf %3, %4 : vector<16x128xf32>
    %6 = arith.truncf %5 : vector<16x128xf32> to vector<16x128xbf16>
    %cst_5 = arith.constant 0.000000e+00 : bf16
    %7 = vector.broadcast %cst_5 : bf16 to vector<16x128xbf16>
    %8 = arith.maximumf %6, %7 : vector<16x128xbf16>
    %c0_6 = arith.constant 0 : index
    %c0_7 = arith.constant 0 : index
    %9 = vector.load %arg4[%c0_6, %c0_7] : memref<128x128xbf16, #tpu.memory_space<vmem>>, vector<128x128xbf16>
    %c0_8 = arith.constant 0 : index
    %c0_9 = arith.constant 0 : index
    %10 = vector.load %arg5[%c0_8, %c0_9] : memref<1x128xf32, #tpu.memory_space<vmem>>, vector<1x128xf32>
    %cst_10 = arith.constant dense<0.000000e+00> : vector<16x128xf32>
    %11 = tpu.matmul %8, %9, %cst_10 {dimension_numbers = #tpu.dot_dimension_numbers<[1], [0], [0], [1], [0, 0, 1, 1], [], []>} : vector<16x128xbf16>, vector<128x128xbf16>, vector<16x128xf32> -> vector<16x128xf32>
    %12 = vector.broadcast %10 : vector<1x128xf32> to vector<16x128xf32>
    %13 = arith.addf %11, %12 : vector<16x128xf32>
    %14 = arith.truncf %13 : vector<16x128xf32> to vector<16x128xbf16>
    %cst_11 = arith.constant 0.000000e+00 : bf16
    %15 = vector.broadcast %cst_11 : bf16 to vector<16x128xbf16>
    %16 = arith.maximumf %14, %15 : vector<16x128xbf16>
    %c0_12 = arith.constant 0 : index
    %c0_13 = arith.constant 0 : index
    %17 = vector.load %arg6[%c0_12, %c0_13] : memref<128x128xbf16, #tpu.memory_space<vmem>>, vector<128x128xbf16>
    %c0_14 = arith.constant 0 : index
    %c0_15 = arith.constant 0 : index
    %18 = vector.load %arg7[%c0_14, %c0_15] : memref<1x128xf32, #tpu.memory_space<vmem>>, vector<1x128xf32>
    %cst_16 = arith.constant dense<0.000000e+00> : vector<16x128xf32>
    %19 = tpu.matmul %16, %17, %cst_16 {dimension_numbers = #tpu.dot_dimension_numbers<[1], [0], [0], [1], [0, 0, 1, 1], [], []>} : vector<16x128xbf16>, vector<128x128xbf16>, vector<16x128xf32> -> vector<16x128xf32>
    %20 = vector.broadcast %18 : vector<1x128xf32> to vector<16x128xf32>
    %21 = arith.addf %19, %20 : vector<16x128xf32>
    %c0_17 = arith.constant 0 : index
    %c0_18 = arith.constant 0 : index
    %22 = vector.load %arg8[%c0_17, %c0_18] : memref<16x128xf32, #tpu.memory_space<vmem>>, vector<16x128xf32>
    tpu.vector_store %arg8[%c0_17, %c0_18], %21 {strides = array<i32>} : memref<16x128xf32, #tpu.memory_space<vmem>>, vector<16x128xf32>,
    return
  }
  func.func @transform_0(%arg0: i32) -> (i32, i32) {
    %c0_i32 = arith.constant 0 : i32
    %c0_i32_0 = arith.constant 0 : i32
    return %arg0, %c0_i32 : i32, i32
  }
  func.func @transform_1(%arg0: i32) -> (i32, i32) {
    %c0_i32 = arith.constant 0 : i32
    %c0_i32_0 = arith.constant 0 : i32
    %c0_i32_1 = arith.constant 0 : i32
    return %c0_i32, %c0_i32_0 : i32, i32
  }
  func.func @transform_2(%arg0: i32) -> (i32, i32) {
    %c0_i32 = arith.constant 0 : i32
    %c0_i32_0 = arith.constant 0 : i32
    %c0_i32_1 = arith.constant 0 : i32
    return %c0_i32, %c0_i32_0 : i32, i32
  }
  func.func @transform_3(%arg0: i32) -> (i32, i32) {
    %c0_i32 = arith.constant 0 : i32
    %c0_i32_0 = arith.constant 0 : i32
    %c0_i32_1 = arith.constant 0 : i32
    return %c0_i32, %c0_i32_0 : i32, i32
  }
  func.func @transform_4(%arg0: i32) -> (i32, i32) {
    %c0_i32 = arith.constant 0 : i32
    %c0_i32_0 = arith.constant 0 : i32
    %c0_i32_1 = arith.constant 0 : i32
    return %c0_i32, %c0_i32_0 : i32, i32
  }
  func.func @transform_5(%arg0: i32) -> (i32, i32) {
    %c0_i32 = arith.constant 0 : i32
    %c0_i32_0 = arith.constant 0 : i32
    %c0_i32_1 = arith.constant 0 : i32
    return %c0_i32, %c0_i32_0 : i32, i32
  }
  func.func @transform_6(%arg0: i32) -> (i32, i32) {
    %c0_i32 = arith.constant 0 : i32
    %c0_i32_0 = arith.constant 0 : i32
    %c0_i32_1 = arith.constant 0 : i32
    return %c0_i32, %c0_i32_0 : i32, i32
  }
  func.func @transform_7(%arg0: i32) -> (i32, i32) {
    %c0_i32 = arith.constant 0 : i32
    %c0_i32_0 = arith.constant 0 : i32
    return %arg0, %c0_i32 : i32, i32
  }
}

module attributes {stable_mosaic.version = 11 : i64} {
  func.func @kernel(%arg0: i32, %arg1: memref<16x128xbf16, #tpu.memory_space<vmem>>, %arg2: memref<128x128xbf16, #tpu.memory_space<vmem>>, %arg3: memref<1x128xf32, #tpu.memory_space<vmem>>, %arg4: memref<128x128xbf16, #tpu.memory_space<vmem>>, %arg5: memref<1x128xf32, #tpu.memory_space<vmem>>, %arg6: memref<128x128xbf16, #tpu.memory_space<vmem>>, %arg7: memref<1x128xf32, #tpu.memory_space<vmem>>, %arg8: memref<16x128xf32, #tpu.memory_space<vmem>>) attributes {dimension_semantics = [#tpu.dimension_semantics<parallel>], iteration_bounds = array<i64: 1>, scalar_prefetch = 0 : i64, scratch_operands = 0 : i64, tpu.core_type = #tpu.core_type<tc>, window_params = [{transform_indices = @transform_0, window_bounds = array<i64: 16, 128>}, {pipeline_mode = #tpu.pipeline_mode<synchronous>, transform_indices = @transform_1, window_bounds = array<i64: 128, 128>}, {pipeline_mode = #tpu.pipeline_mode<synchronous>, transform_indices = @transform_2, window_bounds = array<i64: 1, 128>}, {pipeline_mode = #tpu.pipeline_mode<synchronous>, transform_indices = @transform_3, window_bounds = array<i64: 128, 128>}, {pipeline_mode = #tpu.pipeline_mode<synchronous>, transform_indices = @transform_4, window_bounds = array<i64: 1, 128>}, {pipeline_mode = #tpu.pipeline_mode<synchronous>, transform_indices = @transform_5, window_bounds = array<i64: 128, 128>}, {pipeline_mode = #tpu.pipeline_mode<synchronous>, transform_indices = @transform_6, window_bounds = array<i64: 1, 128>}, {transform_indices = @transform_7, window_bounds = array<i64: 16, 128>}]} {
    %c0 = arith.constant 0 : index
    %c0_0 = arith.constant 0 : index
    %0 = vector.load %arg1[%c0, %c0_0] : memref<16x128xbf16, #tpu.memory_space<vmem>>, vector<16x128xbf16>
    %c0_1 = arith.constant 0 : index
    %c0_2 = arith.constant 0 : index
    %1 = vector.load %arg2[%c0_1, %c0_2] : memref<128x128xbf16, #tpu.memory_space<vmem>>, vector<128x128xbf16>
    %c0_3 = arith.constant 0 : index
    %c0_4 = arith.constant 0 : index
    %2 = vector.load %arg3[%c0_3, %c0_4] : memref<1x128xf32, #tpu.memory_space<vmem>>, vector<1x128xf32>
    %cst = arith.constant dense<0.000000e+00> : vector<16x128xf32>
    %3 = tpu.matmul %0, %1, %cst {dimension_numbers = #tpu.dot_dimension_numbers<[1], [0], [0], [1], [0, 0, 1, 1], [], []>} : vector<16x128xbf16>, vector<128x128xbf16>, vector<16x128xf32> -> vector<16x128xf32>
    %4 = vector.broadcast %2 : vector<1x128xf32> to vector<16x128xf32>
    %5 = arith.addf %3, %4 : vector<16x128xf32>
    %6 = arith.truncf %5 : vector<16x128xf32> to vector<16x128xbf16>
    %cst_5 = arith.constant 0.000000e+00 : bf16
    %7 = vector.broadcast %cst_5 : bf16 to vector<16x128xbf16>
    %8 = arith.maximumf %6, %7 : vector<16x128xbf16>
    %c0_6 = arith.constant 0 : index
    %c0_7 = arith.constant 0 : index
    %9 = vector.load %arg4[%c0_6, %c0_7] : memref<128x128xbf16, #tpu.memory_space<vmem>>, vector<128x128xbf16>
    %c0_8 = arith.constant 0 : index
    %c0_9 = arith.constant 0 : index
    %10 = vector.load %arg5[%c0_8, %c0_9] : memref<1x128xf32, #tpu.memory_space<vmem>>, vector<1x128xf32>
    %cst_10 = arith.constant dense<0.000000e+00> : vector<16x128xf32>
    %11 = tpu.matmul %8, %9, %cst_10 {dimension_numbers = #tpu.dot_dimension_numbers<[1], [0], [0], [1], [0, 0, 1, 1], [], []>} : vector<16x128xbf16>, vector<128x128xbf16>, vector<16x128xf32> -> vector<16x128xf32>
    %12 = vector.broadcast %10 : vector<1x128xf32> to vector<16x128xf32>
    %13 = arith.addf %11, %12 : vector<16x128xf32>
    %14 = arith.truncf %13 : vector<16x128xf32> to vector<16x128xbf16>
    %cst_11 = arith.constant 0.000000e+00 : bf16
    %15 = vector.broadcast %cst_11 : bf16 to vector<16x128xbf16>
    %16 = arith.maximumf %14, %15 : vector<16x128xbf16>
    %c0_12 = arith.constant 0 : index
    %c0_13 = arith.constant 0 : index
    %17 = vector.load %arg6[%c0_12, %c0_13] : memref<128x128xbf16, #tpu.memory_space<vmem>>, vector<128x128xbf16>
    %c0_14 = arith.constant 0 : index
    %c0_15 = arith.constant 0 : index
    %18 = vector.load %arg7[%c0_14, %c0_15] : memref<1x128xf32, #tpu.memory_space<vmem>>, vector<1x128xf32>
    %cst_16 = arith.constant dense<0.000000e+00> : vector<16x128xf32>
    %19 = tpu.matmul %16, %17, %cst_16 {dimension_numbers = #tpu.dot_dimension_numbers<[1], [0], [0], [1], [0, 0, 1, 1], [], []>} : vector<16x128xbf16>, vector<128x128xbf16>, vector<16x128xf32> -> vector<16x128xf32>
    %20 = vector.broadcast %18 : vector<1x128xf32> to vector<16x128xf32>
    %21 = arith.addf %19, %20 : vector<16x128xf32>
    %c0_17 = arith.constant 0 : index
    %c0_18 = arith.constant 0 : index
    %22 = vector.load %arg8[%c0_17, %c0_18] : memref<16x128xf32, #tpu.memory_space<vmem>>, vector<16x128xf32>
    tpu.vector_store %arg8[%c0_17, %c0_18], %21 {strides = array<i32>} : memref<16x128xf32, #tpu.memory_space<vmem>>, vector<16x128xf32>,
    return
  }
  func.func @transform_0(%arg0: i32) -> (i32, i32) {
    %c0_i32 = arith.constant 0 : i32
    %c0_i32_0 = arith.constant 0 : i32
    return %arg0, %c0_i32 : i32, i32
  }
  func.func @transform_1(%arg0: i32) -> (i32, i32) {
    %c0_i32 = arith.constant 0 : i32
    %c0_i32_0 = arith.constant 0 : i32
    %c0_i32_1 = arith.constant 0 : i32
    return %c0_i32, %c0_i32_0 : i32, i32
  }
  func.func @transform_2(%arg0: i32) -> (i32, i32) {
    %c0_i32 = arith.constant 0 : i32
    %c0_i32_0 = arith.constant 0 : i32
    %c0_i32_1 = arith.constant 0 : i32
    return %c0_i32, %c0_i32_0 : i32, i32
  }
  func.func @transform_3(%arg0: i32) -> (i32, i32) {
    %c0_i32 = arith.constant 0 : i32
    %c0_i32_0 = arith.constant 0 : i32
    %c0_i32_1 = arith.constant 0 : i32
    return %c0_i32, %c0_i32_0 : i32, i32
  }
  func.func @transform_4(%arg0: i32) -> (i32, i32) {
    %c0_i32 = arith.constant 0 : i32
    %c0_i32_0 = arith.constant 0 : i32
    %c0_i32_1 = arith.constant 0 : i32
    return %c0_i32, %c0_i32_0 : i32, i32
  }
  func.func @transform_5(%arg0: i32) -> (i32, i32) {
    %c0_i32 = arith.constant 0 : i32
    %c0_i32_0 = arith.constant 0 : i32
    %c0_i32_1 = arith.constant 0 : i32
    return %c0_i32, %c0_i32_0 : i32, i32
  }
  func.func @transform_6(%arg0: i32) -> (i32, i32) {
    %c0_i32 = arith.constant 0 : i32
    %c0_i32_0 = arith.constant 0 : i32
    %c0_i32_1 = arith.constant 0 : i32
    return %c0_i32, %c0_i32_0 : i32, i32
  }
  func.func @transform_7(%arg0: i32) -> (i32, i32) {
    %c0_i32 = arith.constant 0 : i32
    %c0_i32_0 = arith.constant 0 : i32
    return %arg0, %c0_i32 : i32, i32
  }
}

</mosaic_0001>

<bundles_post_ra>
// kernel: tpu_custom_call.1
= control target key start
LH: loop header
LB: loop body
LE: loop exit
PB: predicated region body
PF: predicated region fallthrough
CT: control target
= control target key end

     0   :  { %12 = vsyncpa [#allocation3], 0  ;;  %s899_s0 = inlined_call_operand.hbm [shape: bf16[16,128], index: 0, kind: input, shape index: {}]   ;;  %s900_s1 = inlined_call_operand.hbm [shape: bf16[128,128], index: 1, kind: input, shape index: {}]   ;;  %s901_s2 = inlined_call_operand.vmem [shape: f32[1,128], index: 2, kind: input, shape index: {}]   ;;  %s902_s3 = inlined_call_operand.hbm [shape: bf16[128,128], index: 3, kind: input, shape index: {}]   ;;  %s903_s4 = inlined_call_operand.vmem [shape: f32[1,128], index: 4, kind: input, shape index: {}]   ;;  %s904_s5 = inlined_call_operand.hbm [shape: bf16[128,128], index: 5, kind: input, shape index: {}]   ;;  %s905_s6 = inlined_call_operand.vmem [shape: f32[1,128], index: 6, kind: input, shape index: {}]   ;;  %s906_s7 = inlined_call_operand.hbm [shape: f32[16,128], index: 7, kind: output, shape index: {}]  }
   0x1   :  { %13 = vsyncpa [#allocation6], 0 }
   0x2   :  { %14 = vsyncpa [#allocation9], 0 }
   0x3   :  { %15 = vsyncpa [#allocation4], 0  ;;  %s722_s24 = smov [#allocation5]   ;;  %s723_s26 = smov [#allocation2]  }
   0x4   :  { %s33_s25 = sshll.u32 %s722_s24, 4  ;;  %s21_s27 = sshll.u32 %s723_s26, 4  ;;  %s34_s25 = int_to_ptr.vmem [resolvable:$true] %s33_s25  ;;  %s774_s27 = int_to_ptr.vmem [resolvable:$true] %s21_s27 }
   0x5   :  { %s604_s30 = scalar_lea.hbm %s900_s1, 1024 }
   0x6   :  { %p605_p0 = scmp.ne.s32.totalorder %s900_s1, %s604_s30  ;;  %p608_p1 = scmp.lt.u32.totalorder %s604_s30, %s900_s1 }
   0x8   :  { %p610_p2 = pnand %p608_p1, %p605_p0 }
   0xa   :  { %613 = shalt.err (!%p610_p2)
}
   0xb   :  { %s614_s12 = scalar_lea.vmem %s34_s25, 1024  ;;  %p619_p4 = scmp.lt.s32.totalorder %s34_s25, %s34_s25 }
   0xc   :  { %p615_p3 = scmp.ne.s32.totalorder %s34_s25, %s614_s12  ;;  %p620_p5 = scmp.lt.s32.totalorder %s614_s12, %s614_s12 }
   0xe   :  { %p621_p6 = por %p620_p5, %p619_p4 }
  0x10   :  { %p622_p7 = pnand %p621_p6, %p615_p3 }
  0x12   :  { %625 = shalt.err (!%p622_p7)
}
  0x13   :  { %s724_s13 = smov 64   ;;  %s725_s14 = smov 4  }
  0x14   :  { %39 = dma.hbm_to_vmem [thread:$0]  %s900_s1, 1024, %s34_s25, [#allocation6], %s724_s13, %s724_s13, %s725_s14  }
  0x15   :  { %s626_s19 = scalar_lea.hbm %s899_s0, 128 }
  0x16   :  { %p627_p8 = scmp.ne.s32.totalorder %s899_s0, %s626_s19  ;;  %p630_p9 = scmp.lt.u32.totalorder %s626_s19, %s899_s0 }
  0x18   :  { %p632_p10 = pnand %p630_p9, %p627_p8 }
  0x1a   :  { %635 = shalt.err (!%p632_p10)
}
  0x1b   :  { %s636_s24 = scalar_lea.vmem %s774_s27, 128  ;;  %p641_p12 = scmp.lt.s32.totalorder %s774_s27, %s774_s27 }
  0x1c   :  { %p637_p11 = scmp.ne.s32.totalorder %s774_s27, %s636_s24  ;;  %p642_p13 = scmp.lt.s32.totalorder %s636_s24, %s636_s24 }
  0x1e   :  { %p643_p0 = por %p642_p13, %p641_p12 }
  0x20   :  { %p644_p1 = pnand %p643_p0, %p637_p11 }
  0x22   :  { %647 = shalt.err (!%p644_p1)
}
  0x23   :  { %27 = dma.hbm_to_vmem [thread:$0]  %s899_s0, 128, %s774_s27, [#allocation3], %s724_s13, %s724_s13, %s725_s14  }
  0x24   :  { %s726_s26 = smov [#allocation7]   ;;  %s727_s29 = smov [#allocation8]  }
  0x25   :  { %s47_s28 = sshll.u32 %s726_s26, 4  ;;  %s61_s30 = sshll.u32 %s727_s29, 4  ;;  %s48_s28 = int_to_ptr.vmem [resolvable:$true] %s47_s28  ;;  %s811_s30 = int_to_ptr.vmem [resolvable:$true] %s61_s30 }
  0x26   :  { %s648_s10 = scalar_lea.hbm %s902_s3, 1024 }
  0x27   :  { %p649_p2 = scmp.ne.s32.totalorder %s902_s3, %s648_s10  ;;  %p652_p3 = scmp.lt.u32.totalorder %s648_s10, %s902_s3 }
  0x29   :  { %p654_p4 = pnand %p652_p3, %p649_p2 }
  0x2b   :  { %657 = shalt.err (!%p654_p4)
}
  0x2c   :  { %s658_s0 = scalar_lea.vmem %s48_s28, 1024  ;;  %p663_p6 = scmp.lt.s32.totalorder %s48_s28, %s48_s28 }
  0x2d   :  { %p659_p5 = scmp.ne.s32.totalorder %s48_s28, %s658_s0  ;;  %p664_p7 = scmp.lt.s32.totalorder %s658_s0, %s658_s0 }
  0x2f   :  { %p665_p8 = por %p664_p7, %p663_p6 }
  0x31   :  { %p666_p9 = pnand %p665_p8, %p659_p5 }
  0x33   :  { %669 = shalt.err (!%p666_p9)
}
  0x34   :  { %53 = dma.hbm_to_vmem [thread:$0]  %s902_s3, 1024, %s48_s28, [#allocation6], %s724_s13, %s724_s13, %s725_s14  }
  0x35   :  { %s670_s20 = scalar_lea.hbm %s904_s5, 1024 }
  0x36   :  { %p671_p10 = scmp.ne.s32.totalorder %s904_s5, %s670_s20  ;;  %p674_p11 = scmp.lt.u32.totalorder %s670_s20, %s904_s5 }
  0x38   :  { %p676_p12 = pnand %p674_p11, %p671_p10 }
  0x3a   :  { %679 = shalt.err (!%p676_p12)
}
  0x3b   :  { %s680_s1 = scalar_lea.vmem %s811_s30, 1024  ;;  %p685_p0 = scmp.lt.s32.totalorder %s811_s30, %s811_s30 }
  0x3c   :  { %p681_p13 = scmp.ne.s32.totalorder %s811_s30, %s680_s1  ;;  %p686_p1 = scmp.lt.s32.totalorder %s680_s1, %s680_s1 }
  0x3e   :  { %p687_p2 = por %p686_p1, %p685_p0 }
  0x40   :  { %p688_p3 = pnand %p687_p2, %p681_p13 }
  0x42   :  { %691 = shalt.err (!%p688_p3)
}
  0x43   :  { %67 = dma.hbm_to_vmem [thread:$0]  %s904_s5, 1024, %s811_s30, [#allocation9], %s724_s13, %s724_s13, %s725_s14  }
  0x44   :  { %714 = dma.done.wait [#allocation3], 128  }
  0x45   :  { %715 = vsyncadd [#allocation3], 4294967168 }
  0x46   :  { %716 = dma.done.wait [#allocation6], 2048  }
  0x47   :  { %717 = vsyncadd [#allocation6], 4294965248 }
  0x48   :  { %718 = dma.done.wait [#allocation9], 1024  }
  0x49   :  { %719 = vsyncadd [#allocation9], 4294966272  ;;  %v728_v0 = vmov 0.0   ;;  %vm729_vm0 = vmmov 0   ;;  %v579_v1 = vld [vmem:[#allocation5] sm:$0xff]   ;;  %v580_v2 = vld [vmem:[#allocation5 + $0x8] sm:$0xff]  }
  0x4a   :  { %507 = vmatprep.subr.bf16.mxu0 %v728_v0  ;;  %523 = vmatprep.mubr.msk.bf16.mxu0 %vm729_vm0, %v728_v0  ;;  %v581_v3 = vld [vmem:[#allocation5 + $0x10] sm:$0xff]   ;;  %v588_v4 = vld [vmem:[#allocation7] sm:$0xff]   ;;  %v582_v5 = vld [vmem:[#allocation5 + $0x18] sm:$0xff]   ;;  %v730_v32 = vmov 0   ;;  %s731_s29 = smov [#allocation10]  }
  0x4b   :  { %527 = vmatprep.subr.bf16.mxu1 %v728_v0  ;;  %543 = vmatprep.mubr.msk.bf16.mxu1 %vm729_vm0, %v728_v0  ;;  %v589_v6 = vld [vmem:[#allocation7 + $0x8] sm:$0xff]   ;;  %v583_v7 = vld [vmem:[#allocation5 + $0x20] sm:$0xff]   ;;  %v590_v8 = vld [vmem:[#allocation7 + $0x10] sm:$0xff]   ;;  %s438_s30 = sshll.u32 %s731_s29, 4  ;;  %s439_s30 = int_to_ptr.vmem [resolvable:$true] %s438_s30 }
  0x4c   :  { %508 = vmatpush3.bf16.msra.mxu0 %v579_v1  ;;  %528 = vmatpush3.bf16.msra.mxu1 %v588_v4  ;;  %v584_v9 = vld [vmem:[#allocation5 + $0x28] sm:$0xff]   ;;  %v591_v10 = vld [vmem:[#allocation7 + $0x18] sm:$0xff]   ;;  %v585_v11 = vld [vmem:[#allocation5 + $0x30] sm:$0xff]   ;;  %p697_p5 = scmp.lt.s32.totalorder %s439_s30, %s439_s30 }
  0x4d   :  { %509 = vmatprep.subr.bf16.mxu0 %v728_v0  ;;  %529 = vmatprep.subr.bf16.mxu1 %v728_v0  ;;  %v592_v12 = vld [vmem:[#allocation7 + $0x20] sm:$0xff]   ;;  %v586_v13 = vld [vmem:[#allocation5 + $0x38] sm:$0xff]   ;;  %v593_v14 = vld [vmem:[#allocation7 + $0x28] sm:$0xff]  }
  0x4e   :  { %v587_v15 = vld [vmem:[#allocation2] sm:$0xff]   ;;  %v594_v16 = vld [vmem:[#allocation7 + $0x30] sm:$0xff]   ;;  %v596_v18 = vld [vmem:[#allocation8] sm:$0xff]  }
  0x4f   :  { %v595_v17 = vld [vmem:[#allocation7 + $0x38] sm:$0xff]   ;;  %v597_v19 = vld [vmem:[#allocation8 + $0x8] sm:$0xff]   ;;  %v598_v20 = vld [vmem:[#allocation8 + $0x10] sm:$0xff]  }
  0x50   :  { %510 = vmatpush3.bf16.msra.mxu0 %v580_v2  ;;  %530 = vmatpush3.bf16.msra.mxu1 %v589_v6  ;;  %v599_v21 = vld [vmem:[#allocation8 + $0x18] sm:$0xff]   ;;  %v600_v22 = vld [vmem:[#allocation8 + $0x20] sm:$0xff]   ;;  %v601_v23 = vld [vmem:[#allocation8 + $0x28] sm:$0xff]  }
  0x51   :  { %511 = vmatprep.subr.bf16.mxu0 %v728_v0  ;;  %531 = vmatprep.subr.bf16.mxu1 %v728_v0  ;;  %v452_v24 = vld [vmem:[%s901_s2] ss:$0 sm:$0xff]  ;;  %v602_v34 = vld [vmem:[#allocation8 + $0x30] sm:$0xff]  }
  0x52   :  { %v603_v35 = vld [vmem:[#allocation8 + $0x38] sm:$0xff]  }
  0x53   :  { %v462_v36 = vld [vmem:[%s903_s4] ss:$0 sm:$0xff]  ;;  %s692_s4 = scalar_lea.vmem %s439_s30, 256 }
  0x54   :  { %512 = vmatpush3.bf16.msra.mxu0 %v581_v3  ;;  %532 = vmatpush3.bf16.msra.mxu1 %v590_v8  ;;  %v471_v45 = vld [vmem:[%s905_s6] ss:$0 sm:$0xff]  ;;  %p693_p4 = scmp.ne.s32.totalorder %s439_s30, %s692_s4  ;;  %p698_p6 = scmp.lt.s32.totalorder %s692_s4, %s692_s4 }
  0x55   :  { %513 = vmatprep.subr.bf16.mxu0 %v728_v0  ;;  %533 = vmatprep.subr.bf16.mxu1 %v728_v0 }
  0x56   :  { %p699_p7 = por %p698_p6, %p697_p5 }
  0x58   :  { %514 = vmatpush3.bf16.msra.mxu0 %v582_v5  ;;  %534 = vmatpush3.bf16.msra.mxu1 %v591_v10  ;;  %p700_p8 = pnand %p699_p7, %p693_p4 }
  0x59   :  { %515 = vmatprep.subr.bf16.mxu0 %v728_v0  ;;  %535 = vmatprep.subr.bf16.mxu1 %v728_v0 }
  0x5c   :  { %516 = vmatpush3.bf16.msra.mxu0 %v583_v7  ;;  %536 = vmatpush3.bf16.msra.mxu1 %v592_v12 }
  0x5d   :  { %517 = vmatprep.subr.bf16.mxu0 %v728_v0  ;;  %537 = vmatprep.subr.bf16.mxu1 %v728_v0 }
  0x60   :  { %518 = vmatpush3.bf16.msra.mxu0 %v584_v9  ;;  %538 = vmatpush3.bf16.msra.mxu1 %v593_v14 }
  0x61   :  { %519 = vmatprep.subr.bf16.mxu0 %v728_v0  ;;  %539 = vmatprep.subr.bf16.mxu1 %v728_v0 }
  0x64   :  { %520 = vmatpush3.bf16.msra.mxu0 %v585_v11  ;;  %540 = vmatpush3.bf16.msra.mxu1 %v594_v16 }
  0x65   :  { %521 = vmatprep.subr.bf16.mxu0 %v728_v0  ;;  %541 = vmatprep.subr.bf16.mxu1 %v728_v0 }
  0x68   :  { %522 = vmatpush3.bf16.msra.mxu0 %v586_v13  ;;  %542 = vmatpush3.bf16.msra.mxu1 %v595_v17 }
  0x69   :  { %547 = vmatprep.subr.bf16.mxu0 %v728_v0 }
  0x6b   :  { %524 = vmatmul.mubr.bf16.vlgmr.msra.gmra.mrb[0].mxu0 %v587_v15 }
  0x6c   :  { %563 = vmatprep.mubr.msk.bf16.mxu0 %vm729_vm0, %v728_v0  ;;  %548 = vmatpush3.bf16.msra.mxu0 %v596_v18 }
  0x6d   :  { %549 = vmatprep.subr.bf16.mxu0 %v728_v0 }
  0x70   :  { %550 = vmatpush3.bf16.msra.mxu0 %v597_v19 }
  0x71   :  { %551 = vmatprep.subr.bf16.mxu0 %v728_v0 }
  0x74   :  { %552 = vmatpush3.bf16.msra.mxu0 %v598_v20 }
  0x75   :  { %553 = vmatprep.subr.bf16.mxu0 %v728_v0 }
  0x78   :  { %554 = vmatpush3.bf16.msra.mxu0 %v599_v21 }
  0x79   :  { %555 = vmatprep.subr.bf16.mxu0 %v728_v0 }
  0x7c   :  { %556 = vmatpush3.bf16.msra.mxu0 %v600_v22 }
  0x7d   :  { %557 = vmatprep.subr.bf16.mxu0 %v728_v0 }
  0x80   :  { %558 = vmatpush3.bf16.msra.mxu0 %v601_v23 }
  0x81   :  { %559 = vmatprep.subr.bf16.mxu0 %v728_v0 }
  0x84   :  { %560 = vmatpush3.bf16.msra.mxu0 %v602_v34 }
  0x85   :  { %561 = vmatprep.subr.bf16.mxu0 %v728_v0 }
  0x88   :  { %562 = vmatpush3.bf16.msra.mxu0 %v603_v35 }
 0x13e   :  { %v196_v25 = vpop.f32.mrb[0].mxu0 }
 0x13f   :  { %v525_v26 = vpop.f32.mrb[1].mxu0  ;;  %v197_v28 = vadd.f32 %v452_v24, %v196_v25 }
 0x140   :  { %v199_v27 = vpop.f32.mrb[2].mxu0 }
 0x141   :  { %v200_v29 = vadd.f32 %v452_v24, %v199_v27  ;;  %v526_v30 = vpop.f32.mrb[3].mxu0 }
 0x143   :  { %v203_v31 = vpack.c.bf16 %v200_v29, %v197_v28 }
 0x145   :  { %v204_v33 = vmax.bf16 %v730_v32, %v203_v31 }
 0x147   :  { %544 = vmatmul.mubr.bf16.vlgmr.msra.gmra.mrb[0].mxu1 %v204_v33 }
 0x21a   :  { %v310_v37 = vpop.f32.mrb[0].mxu1 }
 0x21b   :  { %v545_v38 = vpop.f32.mrb[1].mxu1  ;;  %v311_v40 = vadd.f32 %v462_v36, %v310_v37 }
 0x21c   :  { %v313_v39 = vpop.f32.mrb[2].mxu1 }
 0x21d   :  { %v314_v41 = vadd.f32 %v462_v36, %v313_v39  ;;  %v546_v42 = vpop.f32.mrb[3].mxu1 }
 0x21f   :  { %v317_v43 = vpack.c.bf16 %v314_v41, %v311_v40 }
 0x221   :  { %v318_v44 = vmax.bf16 %v730_v32, %v317_v43 }
 0x223   :  { %564 = vmatmul.mubr.bf16.vlgmr.msra.gmra.mrb[4].mxu0 %v318_v44 }
 0x2f6   :  { %v424_v46 = vpop.f32.mrb[4].mxu0 }
 0x2f7   :  { %v425_v47 = vadd.f32 %v471_v45, %v424_v46  ;;  %v565_v48 = vpop.f32.mrb[5].mxu0 }
 0x2f8   :  { %v427_v49 = vpop.f32.mrb[6].mxu0 }
 0x2f9   :  { %431 = vst [vmem:[#allocation10] sm:$0xff] %v425_v47  ;;  %v428_v50 = vadd.f32 %v471_v45, %v427_v49  ;;  %v566_v51 = vpop.f32.mrb[7].mxu0 }
 0x2fb   :  { %432 = vst [vmem:[#allocation10 + $0x8] sm:$0xff] %v428_v50 }
 0x2fc   :  { %703 = shalt.err (!%p700_p8)
}
 0x2fd   :  { %s704_s9 = scalar_lea.hbm %s906_s7, 256 }
 0x2fe   :  { %p705_p9 = scmp.ne.s32.totalorder %s906_s7, %s704_s9  ;;  %p708_p10 = scmp.lt.u32.totalorder %s704_s9, %s906_s7 }
 0x300   :  { %p710_p11 = pnand %p708_p10, %p705_p9 }
 0x302   :  { %713 = shalt.err (!%p710_p11)
}
 0x303   :  { %s732_s16 = smov 128   ;;  %s733_s0 = smov 8  }
 0x304   :  { %444 = dma.vmem_to_hbm [thread:$0]  %s439_s30, 256, %s906_s7, [#allocation4], %s732_s16, %s732_s16, %s733_s0  }
 0x305   :  { %720 = dma.done.wait [#allocation4], 256  }
 0x306   :  { %721 = vsyncadd [#allocation4], 4294967040 }
 0x307   :  { %448 = vsyncpa [#allocation3], 1 }
 0x308   :  { %449 = vsyncpa [#allocation6], 1 }
 0x309   :  { %450 = vsyncpa [#allocation9], 1 }
 0x30a   :  { %451 = vsyncpa [#allocation4], 1 }

// kernel: tpu_custom_call.1
= control target key start
LH: loop header
LB: loop body
LE: loop exit
PB: predicated region body
PF: predicated region fallthrough
CT: control target
= control target key end

     0   :  { %12 = vsyncpa [#allocation3], 0  ;;  %s899_s0 = inlined_call_operand.hbm [shape: bf16[16,128], index: 0, kind: input, shape index: {}]   ;;  %s900_s1 = inlined_call_operand.hbm [shape: bf16[128,128], index: 1, kind: input, shape index: {}]   ;;  %s901_s2 = inlined_call_operand.vmem [shape: f32[1,128], index: 2, kind: input, shape index: {}]   ;;  %s902_s3 = inlined_call_operand.hbm [shape: bf16[128,128], index: 3, kind: input, shape index: {}]   ;;  %s903_s4 = inlined_call_operand.vmem [shape: f32[1,128], index: 4, kind: input, shape index: {}]   ;;  %s904_s5 = inlined_call_operand.hbm [shape: bf16[128,128], index: 5, kind: input, shape index: {}]   ;;  %s905_s6 = inlined_call_operand.vmem [shape: f32[1,128], index: 6, kind: input, shape index: {}]   ;;  %s906_s7 = inlined_call_operand.hbm [shape: f32[16,128], index: 7, kind: output, shape index: {}]  }
   0x1   :  { %13 = vsyncpa [#allocation6], 0 }
   0x2   :  { %14 = vsyncpa [#allocation9], 0 }
   0x3   :  { %15 = vsyncpa [#allocation4], 0  ;;  %s722_s24 = smov [#allocation5]   ;;  %s723_s26 = smov [#allocation2]  }
   0x4   :  { %s33_s25 = sshll.u32 %s722_s24, 4  ;;  %s21_s27 = sshll.u32 %s723_s26, 4  ;;  %s34_s25 = int_to_ptr.vmem [resolvable:$true] %s33_s25  ;;  %s774_s27 = int_to_ptr.vmem [resolvable:$true] %s21_s27 }
   0x5   :  { %s604_s30 = scalar_lea.hbm %s900_s1, 1024 }
   0x6   :  { %p605_p0 = scmp.ne.s32.totalorder %s900_s1, %s604_s30  ;;  %p608_p1 = scmp.lt.u32.totalorder %s604_s30, %s900_s1 }
   0x8   :  { %p610_p2 = pnand %p608_p1, %p605_p0 }
   0xa   :  { %613 = shalt.err (!%p610_p2)
}
   0xb   :  { %s614_s12 = scalar_lea.vmem %s34_s25, 1024  ;;  %p619_p4 = scmp.lt.s32.totalorder %s34_s25, %s34_s25 }
   0xc   :  { %p615_p3 = scmp.ne.s32.totalorder %s34_s25, %s614_s12  ;;  %p620_p5 = scmp.lt.s32.totalorder %s614_s12, %s614_s12 }
   0xe   :  { %p621_p6 = por %p620_p5, %p619_p4 }
  0x10   :  { %p622_p7 = pnand %p621_p6, %p615_p3 }
  0x12   :  { %625 = shalt.err (!%p622_p7)
}
  0x13   :  { %s724_s13 = smov 64   ;;  %s725_s14 = smov 4  }
  0x14   :  { %39 = dma.hbm_to_vmem [thread:$0]  %s900_s1, 1024, %s34_s25, [#allocation6], %s724_s13, %s724_s13, %s725_s14  }
  0x15   :  { %s626_s19 = scalar_lea.hbm %s899_s0, 128 }
  0x16   :  { %p627_p8 = scmp.ne.s32.totalorder %s899_s0, %s626_s19  ;;  %p630_p9 = scmp.lt.u32.totalorder %s626_s19, %s899_s0 }
  0x18   :  { %p632_p10 = pnand %p630_p9, %p627_p8 }
  0x1a   :  { %635 = shalt.err (!%p632_p10)
}
  0x1b   :  { %s636_s24 = scalar_lea.vmem %s774_s27, 128  ;;  %p641_p12 = scmp.lt.s32.totalorder %s774_s27, %s774_s27 }
  0x1c   :  { %p637_p11 = scmp.ne.s32.totalorder %s774_s27, %s636_s24  ;;  %p642_p13 = scmp.lt.s32.totalorder %s636_s24, %s636_s24 }
  0x1e   :  { %p643_p0 = por %p642_p13, %p641_p12 }
  0x20   :  { %p644_p1 = pnand %p643_p0, %p637_p11 }
  0x22   :  { %647 = shalt.err (!%p644_p1)
}
  0x23   :  { %27 = dma.hbm_to_vmem [thread:$0]  %s899_s0, 128, %s774_s27, [#allocation3], %s724_s13, %s724_s13, %s725_s14  }
  0x24   :  { %s726_s26 = smov [#allocation7]   ;;  %s727_s29 = smov [#allocation8]  }
  0x25   :  { %s47_s28 = sshll.u32 %s726_s26, 4  ;;  %s61_s30 = sshll.u32 %s727_s29, 4  ;;  %s48_s28 = int_to_ptr.vmem [resolvable:$true] %s47_s28  ;;  %s811_s30 = int_to_ptr.vmem [resolvable:$true] %s61_s30 }
  0x26   :  { %s648_s10 = scalar_lea.hbm %s902_s3, 1024 }
  0x27   :  { %p649_p2 = scmp.ne.s32.totalorder %s902_s3, %s648_s10  ;;  %p652_p3 = scmp.lt.u32.totalorder %s648_s10, %s902_s3 }
  0x29   :  { %p654_p4 = pnand %p652_p3, %p649_p2 }
  0x2b   :  { %657 = shalt.err (!%p654_p4)
}
  0x2c   :  { %s658_s0 = scalar_lea.vmem %s48_s28, 1024  ;;  %p663_p6 = scmp.lt.s32.totalorder %s48_s28, %s48_s28 }
  0x2d   :  { %p659_p5 = scmp.ne.s32.totalorder %s48_s28, %s658_s0  ;;  %p664_p7 = scmp.lt.s32.totalorder %s658_s0, %s658_s0 }
  0x2f   :  { %p665_p8 = por %p664_p7, %p663_p6 }
  0x31   :  { %p666_p9 = pnand %p665_p8, %p659_p5 }
  0x33   :  { %669 = shalt.err (!%p666_p9)
}
  0x34   :  { %53 = dma.hbm_to_vmem [thread:$0]  %s902_s3, 1024, %s48_s28, [#allocation6], %s724_s13, %s724_s13, %s725_s14  }
  0x35   :  { %s670_s20 = scalar_lea.hbm %s904_s5, 1024 }
  0x36   :  { %p671_p10 = scmp.ne.s32.totalorder %s904_s5, %s670_s20  ;;  %p674_p11 = scmp.lt.u32.totalorder %s670_s20, %s904_s5 }
  0x38   :  { %p676_p12 = pnand %p674_p11, %p671_p10 }
  0x3a   :  { %679 = shalt.err (!%p676_p12)
}
  0x3b   :  { %s680_s1 = scalar_lea.vmem %s811_s30, 1024  ;;  %p685_p0 = scmp.lt.s32.totalorder %s811_s30, %s811_s30 }
  0x3c   :  { %p681_p13 = scmp.ne.s32.totalorder %s811_s30, %s680_s1  ;;  %p686_p1 = scmp.lt.s32.totalorder %s680_s1, %s680_s1 }
  0x3e   :  { %p687_p2 = por %p686_p1, %p685_p0 }
  0x40   :  { %p688_p3 = pnand %p687_p2, %p681_p13 }
  0x42   :  { %691 = shalt.err (!%p688_p3)
}
  0x43   :  { %67 = dma.hbm_to_vmem [thread:$0]  %s904_s5, 1024, %s811_s30, [#allocation9], %s724_s13, %s724_s13, %s725_s14  }
  0x44   :  { %714 = dma.done.wait [#allocation3], 128  }
  0x45   :  { %715 = vsyncadd [#allocation3], 4294967168 }
  0x46   :  { %716 = dma.done.wait [#allocation6], 2048  }
  0x47   :  { %717 = vsyncadd [#allocation6], 4294965248 }
  0x48   :  { %718 = dma.done.wait [#allocation9], 1024  }
  0x49   :  { %719 = vsyncadd [#allocation9], 4294966272  ;;  %v728_v0 = vmov 0.0   ;;  %vm729_vm0 = vmmov 0   ;;  %v579_v1 = vld [vmem:[#allocation5] sm:$0xff]   ;;  %v580_v2 = vld [vmem:[#allocation5 + $0x8] sm:$0xff]  }
  0x4a   :  { %507 = vmatprep.subr.bf16.mxu0 %v728_v0  ;;  %523 = vmatprep.mubr.msk.bf16.mxu0 %vm729_vm0, %v728_v0  ;;  %v581_v3 = vld [vmem:[#allocation5 + $0x10] sm:$0xff]   ;;  %v588_v4 = vld [vmem:[#allocation7] sm:$0xff]   ;;  %v582_v5 = vld [vmem:[#allocation5 + $0x18] sm:$0xff]   ;;  %v730_v32 = vmov 0   ;;  %s731_s29 = smov [#allocation10]  }
  0x4b   :  { %527 = vmatprep.subr.bf16.mxu1 %v728_v0  ;;  %543 = vmatprep.mubr.msk.bf16.mxu1 %vm729_vm0, %v728_v0  ;;  %v589_v6 = vld [vmem:[#allocation7 + $0x8] sm:$0xff]   ;;  %v583_v7 = vld [vmem:[#allocation5 + $0x20] sm:$0xff]   ;;  %v590_v8 = vld [vmem:[#allocation7 + $0x10] sm:$0xff]   ;;  %s438_s30 = sshll.u32 %s731_s29, 4  ;;  %s439_s30 = int_to_ptr.vmem [resolvable:$true] %s438_s30 }
  0x4c   :  { %508 = vmatpush3.bf16.msra.mxu0 %v579_v1  ;;  %528 = vmatpush3.bf16.msra.mxu1 %v588_v4  ;;  %v584_v9 = vld [vmem:[#allocation5 + $0x28] sm:$0xff]   ;;  %v591_v10 = vld [vmem:[#allocation7 + $0x18] sm:$0xff]   ;;  %v585_v11 = vld [vmem:[#allocation5 + $0x30] sm:$0xff]   ;;  %p697_p5 = scmp.lt.s32.totalorder %s439_s30, %s439_s30 }
  0x4d   :  { %509 = vmatprep.subr.bf16.mxu0 %v728_v0  ;;  %529 = vmatprep.subr.bf16.mxu1 %v728_v0  ;;  %v592_v12 = vld [vmem:[#allocation7 + $0x20] sm:$0xff]   ;;  %v586_v13 = vld [vmem:[#allocation5 + $0x38] sm:$0xff]   ;;  %v593_v14 = vld [vmem:[#allocation7 + $0x28] sm:$0xff]  }
  0x4e   :  { %v587_v15 = vld [vmem:[#allocation2] sm:$0xff]   ;;  %v594_v16 = vld [vmem:[#allocation7 + $0x30] sm:$0xff]   ;;  %v596_v18 = vld [vmem:[#allocation8] sm:$0xff]  }
  0x4f   :  { %v595_v17 = vld [vmem:[#allocation7 + $0x38] sm:$0xff]   ;;  %v597_v19 = vld [vmem:[#allocation8 + $0x8] sm:$0xff]   ;;  %v598_v20 = vld [vmem:[#allocation8 + $0x10] sm:$0xff]  }
  0x50   :  { %510 = vmatpush3.bf16.msra.mxu0 %v580_v2  ;;  %530 = vmatpush3.bf16.msra.mxu1 %v589_v6  ;;  %v599_v21 = vld [vmem:[#allocation8 + $0x18] sm:$0xff]   ;;  %v600_v22 = vld [vmem:[#allocation8 + $0x20] sm:$0xff]   ;;  %v601_v23 = vld [vmem:[#allocation8 + $0x28] sm:$0xff]  }
  0x51   :  { %511 = vmatprep.subr.bf16.mxu0 %v728_v0  ;;  %531 = vmatprep.subr.bf16.mxu1 %v728_v0  ;;  %v452_v24 = vld [vmem:[%s901_s2] ss:$0 sm:$0xff]  ;;  %v602_v34 = vld [vmem:[#allocation8 + $0x30] sm:$0xff]  }
  0x52   :  { %v603_v35 = vld [vmem:[#allocation8 + $0x38] sm:$0xff]  }
  0x53   :  { %v462_v36 = vld [vmem:[%s903_s4] ss:$0 sm:$0xff]  ;;  %s692_s4 = scalar_lea.vmem %s439_s30, 256 }
  0x54   :  { %512 = vmatpush3.bf16.msra.mxu0 %v581_v3  ;;  %532 = vmatpush3.bf16.msra.mxu1 %v590_v8  ;;  %v471_v45 = vld [vmem:[%s905_s6] ss:$0 sm:$0xff]  ;;  %p693_p4 = scmp.ne.s32.totalorder %s439_s30, %s692_s4  ;;  %p698_p6 = scmp.lt.s32.totalorder %s692_s4, %s692_s4 }
  0x55   :  { %513 = vmatprep.subr.bf16.mxu0 %v728_v0  ;;  %533 = vmatprep.subr.bf16.mxu1 %v728_v0 }
  0x56   :  { %p699_p7 = por %p698_p6, %p697_p5 }
  0x58   :  { %514 = vmatpush3.bf16.msra.mxu0 %v582_v5  ;;  %534 = vmatpush3.bf16.msra.mxu1 %v591_v10  ;;  %p700_p8 = pnand %p699_p7, %p693_p4 }
  0x59   :  { %515 = vmatprep.subr.bf16.mxu0 %v728_v0  ;;  %535 = vmatprep.subr.bf16.mxu1 %v728_v0 }
  0x5c   :  { %516 = vmatpush3.bf16.msra.mxu0 %v583_v7  ;;  %536 = vmatpush3.bf16.msra.mxu1 %v592_v12 }
  0x5d   :  { %517 = vmatprep.subr.bf16.mxu0 %v728_v0  ;;  %537 = vmatprep.subr.bf16.mxu1 %v728_v0 }
  0x60   :  { %518 = vmatpush3.bf16.msra.mxu0 %v584_v9  ;;  %538 = vmatpush3.bf16.msra.mxu1 %v593_v14 }
  0x61   :  { %519 = vmatprep.subr.bf16.mxu0 %v728_v0  ;;  %539 = vmatprep.subr.bf16.mxu1 %v728_v0 }
  0x64   :  { %520 = vmatpush3.bf16.msra.mxu0 %v585_v11  ;;  %540 = vmatpush3.bf16.msra.mxu1 %v594_v16 }
  0x65   :  { %521 = vmatprep.subr.bf16.mxu0 %v728_v0  ;;  %541 = vmatprep.subr.bf16.mxu1 %v728_v0 }
  0x68   :  { %522 = vmatpush3.bf16.msra.mxu0 %v586_v13  ;;  %542 = vmatpush3.bf16.msra.mxu1 %v595_v17 }
  0x69   :  { %547 = vmatprep.subr.bf16.mxu0 %v728_v0 }
  0x6b   :  { %524 = vmatmul.mubr.bf16.vlgmr.msra.gmra.mrb[0].mxu0 %v587_v15 }
  0x6c   :  { %563 = vmatprep.mubr.msk.bf16.mxu0 %vm729_vm0, %v728_v0  ;;  %548 = vmatpush3.bf16.msra.mxu0 %v596_v18 }
  0x6d   :  { %549 = vmatprep.subr.bf16.mxu0 %v728_v0 }
  0x70   :  { %550 = vmatpush3.bf16.msra.mxu0 %v597_v19 }
  0x71   :  { %551 = vmatprep.subr.bf16.mxu0 %v728_v0 }
  0x74   :  { %552 = vmatpush3.bf16.msra.mxu0 %v598_v20 }
  0x75   :  { %553 = vmatprep.subr.bf16.mxu0 %v728_v0 }
  0x78   :  { %554 = vmatpush3.bf16.msra.mxu0 %v599_v21 }
  0x79   :  { %555 = vmatprep.subr.bf16.mxu0 %v728_v0 }
  0x7c   :  { %556 = vmatpush3.bf16.msra.mxu0 %v600_v22 }
  0x7d   :  { %557 = vmatprep.subr.bf16.mxu0 %v728_v0 }
  0x80   :  { %558 = vmatpush3.bf16.msra.mxu0 %v601_v23 }
  0x81   :  { %559 = vmatprep.subr.bf16.mxu0 %v728_v0 }
  0x84   :  { %560 = vmatpush3.bf16.msra.mxu0 %v602_v34 }
  0x85   :  { %561 = vmatprep.subr.bf16.mxu0 %v728_v0 }
  0x88   :  { %562 = vmatpush3.bf16.msra.mxu0 %v603_v35 }
 0x13e   :  { %v196_v25 = vpop.f32.mrb[0].mxu0 }
 0x13f   :  { %v525_v26 = vpop.f32.mrb[1].mxu0  ;;  %v197_v28 = vadd.f32 %v452_v24, %v196_v25 }
 0x140   :  { %v199_v27 = vpop.f32.mrb[2].mxu0 }
 0x141   :  { %v200_v29 = vadd.f32 %v452_v24, %v199_v27  ;;  %v526_v30 = vpop.f32.mrb[3].mxu0 }
 0x143   :  { %v203_v31 = vpack.c.bf16 %v200_v29, %v197_v28 }
 0x145   :  { %v204_v33 = vmax.bf16 %v730_v32, %v203_v31 }
 0x147   :  { %544 = vmatmul.mubr.bf16.vlgmr.msra.gmra.mrb[0].mxu1 %v204_v33 }
 0x21a   :  { %v310_v37 = vpop.f32.mrb[0].mxu1 }
 0x21b   :  { %v545_v38 = vpop.f32.mrb[1].mxu1  ;;  %v311_v40 = vadd.f32 %v462_v36, %v310_v37 }
 0x21c   :  { %v313_v39 = vpop.f32.mrb[2].mxu1 }
 0x21d   :  { %v314_v41 = vadd.f32 %v462_v36, %v313_v39  ;;  %v546_v42 = vpop.f32.mrb[3].mxu1 }
 0x21f   :  { %v317_v43 = vpack.c.bf16 %v314_v41, %v311_v40 }
 0x221   :  { %v318_v44 = vmax.bf16 %v730_v32, %v317_v43 }
 0x223   :  { %564 = vmatmul.mubr.bf16.vlgmr.msra.gmra.mrb[4].mxu0 %v318_v44 }
 0x2f6   :  { %v424_v46 = vpop.f32.mrb[4].mxu0 }
 0x2f7   :  { %v425_v47 = vadd.f32 %v471_v45, %v424_v46  ;;  %v565_v48 = vpop.f32.mrb[5].mxu0 }
 0x2f8   :  { %v427_v49 = vpop.f32.mrb[6].mxu0 }
 0x2f9   :  { %431 = vst [vmem:[#allocation10] sm:$0xff] %v425_v47  ;;  %v428_v50 = vadd.f32 %v471_v45, %v427_v49  ;;  %v566_v51 = vpop.f32.mrb[7].mxu0 }
 0x2fb   :  { %432 = vst [vmem:[#allocation10 + $0x8] sm:$0xff] %v428_v50 }
 0x2fc   :  { %703 = shalt.err (!%p700_p8)
}
 0x2fd   :  { %s704_s9 = scalar_lea.hbm %s906_s7, 256 }
 0x2fe   :  { %p705_p9 = scmp.ne.s32.totalorder %s906_s7, %s704_s9  ;;  %p708_p10 = scmp.lt.u32.totalorder %s704_s9, %s906_s7 }
 0x300   :  { %p710_p11 = pnand %p708_p10, %p705_p9 }
 0x302   :  { %713 = shalt.err (!%p710_p11)
}
 0x303   :  { %s732_s16 = smov 128   ;;  %s733_s0 = smov 8  }
 0x304   :  { %444 = dma.vmem_to_hbm [thread:$0]  %s439_s30, 256, %s906_s7, [#allocation4], %s732_s16, %s732_s16, %s733_s0  }
 0x305   :  { %720 = dma.done.wait [#allocation4], 256  }
 0x306   :  { %721 = vsyncadd [#allocation4], 4294967040 }
 0x307   :  { %448 = vsyncpa [#allocation3], 1 }
 0x308   :  { %449 = vsyncpa [#allocation6], 1 }
 0x309   :  { %450 = vsyncpa [#allocation9], 1 }
 0x30a   :  { %451 = vsyncpa [#allocation4], 1 }

</bundles_post_ra>
